<compile_context>
chip_gen: v7x
topology: tpu7x:2x2x1
jax: 0.10.0
libtpu: 0.0.40
codegen_flags: <defaults>
</compile_context>

<pallas_src>
import functools
import math

import jax
import jax.numpy as jnp
from jax import lax
from jax.experimental import pallas as pl
from jax.experimental.pallas import tpu as pltpu

# Explicit scoped-VMEM budget: matches the v6e/v7x default, raises v5e's 16 MiB
# default, and leaves headroom on v7x's 64 MiB physical VMEM per TensorCore.
_VMEM_LIMIT_BYTES = 32 * 1024 * 1024


def _pick_seq_tile(n, target):
    """Largest tile <= target that divides n exactly (softmax correctness needs
    un-padded kv blocks). Falls back to the full dim if no multiple-of-8 divisor."""
    t = min(target, n)
    while n % t != 0:
        t -= 1
    if t != n and t % 8 != 0:
        t = n
    return t


def _pick_k_tile(k, target):
    """Reduction tile for the linear: multiple of 128 (lane rule on the x block)
    that divides K exactly, or K itself."""
    if k <= target:
        return k
    t = (target // 128) * 128
    while t >= 128:
        if k % t == 0:
            return t
        t -= 128
    return k


# ----------------------------------------------------------------------------
# Linear (matmul + bias), tiled over rows (M), output cols (N) and reduction (K)
# ----------------------------------------------------------------------------
def _linear_kernel(x_ref, w_ref, b_ref, o_ref, acc_ref):
    k = pl.program_id(2)

    @pl.when(k == 0)
    def _init():
        acc_ref[...] = jnp.zeros(acc_ref.shape, acc_ref.dtype)

    x = x_ref[...]
    w = w_ref[...]
    if x.dtype != jnp.bfloat16:                    # only the f32 module input needs this
        x = x.astype(jnp.bfloat16)
    if w.dtype != jnp.bfloat16:
        w = w.astype(jnp.bfloat16)
    acc_ref[...] += jnp.dot(x, w, preferred_element_type=jnp.float32)

    @pl.when(k == pl.num_programs(2) - 1)
    def _finalize():
        o_ref[...] = (acc_ref[...] + b_ref[...]).astype(o_ref.dtype)


def pallas_linear(x2d, w, b, *, out_dtype=None, tm=256, tn=256, tk=512):
    """x2d: (M, K), w: (K, N) bf16, b: (1, N) f32  ->  (M, N) = x2d @ w + b."""
    M, K = x2d.shape
    Kw, N = w.shape
    assert K == Kw
    out_dtype = x2d.dtype if out_dtype is None else out_dtype
    tm = min(tm, M)
    tn = min(tn, N)
    tkk = _pick_k_tile(K, tk)
    grid = (pl.cdiv(M, tm), pl.cdiv(N, tn), K // tkk)
    return pl.pallas_call(
        _linear_kernel,
        out_shape=jax.ShapeDtypeStruct((M, N), out_dtype),
        grid_spec=pltpu.PrefetchScalarGridSpec(
            num_scalar_prefetch=0,
            grid=grid,
            in_specs=[
                pl.BlockSpec((tm, tkk), lambda i, j, k: (i, k)),
                pl.BlockSpec((tkk, tn), lambda i, j, k: (k, j)),
                pl.BlockSpec((1, tn), lambda i, j, k: (0, j)),
            ],
            out_specs=pl.BlockSpec((tm, tn), lambda i, j, k: (i, j)),
            scratch_shapes=[pltpu.VMEM((tm, tn), jnp.float32)],
        ),
        compiler_params=pltpu.CompilerParams(
            dimension_semantics=("parallel", "parallel", "arbitrary"),
            vmem_limit_bytes=_VMEM_LIMIT_BYTES),
    )(x2d, w, b)


# ----------------------------------------------------------------------------
# Flash-style multi-head attention over the packed (B, N, 3C) qkv activation.
# All heads handled in-kernel; q/k/v and head splits fused via BlockSpecs and
# static ref slices; lane-dense (tq, C) output store.
# ----------------------------------------------------------------------------
def _flash_attn_kernel(q_ref, k_ref, v_ref, o_ref, m_sc, l_sc, acc_sc, *,
                       num_heads, head_dim, scale):
    kv = pl.program_id(2)

    @pl.when(kv == 0)
    def _init():
        m_sc[...] = jnp.full(m_sc.shape, -jnp.inf, m_sc.dtype)
        l_sc[...] = jnp.zeros(l_sc.shape, l_sc.dtype)
        acc_sc[...] = jnp.zeros(acc_sc.shape, acc_sc.dtype)

    # q-scale hoisted out of the head loop: one full-lane-width multiply.
    q = q_ref[0] * scale                                          # (tq, C) bf16

    for h in range(num_heads):
        lo = h * head_dim
        qh = q[:, lo:lo + head_dim]                               # (tq, Dh) bf16
        kh = k_ref[0, :, lo:lo + head_dim]                        # (tk, Dh) bf16
        vh = v_ref[0, :, lo:lo + head_dim]                        # (tk, Dh) bf16

        # s = q_h @ k_h^T via dot_general contracting last dims (no explicit k.T).
        s = lax.dot_general(qh, kh, (((1,), (1,)), ((), ())),
                            preferred_element_type=jnp.float32)   # (tq, tk) f32

        m_prev = m_sc[h]                                          # (tq, 1) f32
        m_new = jnp.maximum(m_prev, jnp.max(s, axis=-1, keepdims=True))
        alpha = jnp.exp(m_prev - m_new)                           # (tq, 1) f32
        p = jnp.exp(s - m_new)                                    # (tq, tk) f32 softmax math stays f32
        l_sc[h] = alpha * l_sc[h] + jnp.sum(p, axis=-1, keepdims=True)

        pv = lax.dot_general(p.astype(vh.dtype), vh, (((1,), (0,)), ((), ())),
                             preferred_element_type=jnp.float32)  # (tq, Dh) f32
        acc_sc[:, lo:lo + head_dim] = alpha * acc_sc[:, lo:lo + head_dim] + pv
        m_sc[h] = m_new

    @pl.when(kv == pl.num_programs(2) - 1)
    def _finalize():
        # Exact normalization once per q tile, then one dense (tq, C) store.
        for h in range(num_heads):
            lo = h * head_dim
            acc_sc[:, lo:lo + head_dim] = acc_sc[:, lo:lo + head_dim] / l_sc[h]
        o_ref[0] = acc_sc[...].astype(o_ref.dtype)


def pallas_flash_mha_packed(qkv, *, num_heads, scale, tq=256, tk=256):
    """qkv: (B, N, 3C) packed [q | k | v] (heads contiguous within each) -> (B, N, C)."""
    B, N, C3 = qkv.shape
    C = C3 // 3
    head_dim = C // num_heads
    tq = _pick_seq_tile(N, tq)
    tk = _pick_seq_tile(N, tk)
    kern = functools.partial(_flash_attn_kernel, num_heads=num_heads,
                             head_dim=head_dim, scale=scale)
    grid = (B, N // tq, N // tk)
    return pl.pallas_call(
        kern,
        out_shape=jax.ShapeDtypeStruct((B, N, C), qkv.dtype),
        grid_spec=pltpu.PrefetchScalarGridSpec(
            num_scalar_prefetch=0,
            grid=grid,
            in_specs=[
                # same qkv array passed three times; channel block index 0/1/2
                # selects the q / k / v slab of the packed last dim.
                pl.BlockSpec((1, tq, C), lambda b, qi, ki: (b, qi, 0)),
                pl.BlockSpec((1, tk, C), lambda b, qi, ki: (b, ki, 1)),
                pl.BlockSpec((1, tk, C), lambda b, qi, ki: (b, ki, 2)),
            ],
            out_specs=pl.BlockSpec((1, tq, C), lambda b, qi, ki: (b, qi, 0)),
            scratch_shapes=[
                pltpu.VMEM((num_heads, tq, 1), jnp.float32),   # running max m
                pltpu.VMEM((num_heads, tq, 1), jnp.float32),   # running sum l
                pltpu.VMEM((tq, C), jnp.float32),              # dense per-head acc
            ],
        ),
        compiler_params=pltpu.CompilerParams(
            dimension_semantics=("parallel", "parallel", "arbitrary"),
            vmem_limit_bytes=_VMEM_LIMIT_BYTES),
    )(qkv, qkv, qkv)


# ----------------------------------------------------------------------------
# Module: parameter init + forward
# ----------------------------------------------------------------------------
def init_attention_params(key, dim, num_heads=8, qkv_bias=False):
    assert dim % num_heads == 0
    k1, k2, k3, k4 = jax.random.split(key, 4)
    bound = 1.0 / math.sqrt(dim)
    params = {
        # stored as (in, out) so the kernels compute x @ W; weights live in bf16 (HBM-level bf16)
        "w_qkv": jax.random.uniform(k1, (dim, 3 * dim), jnp.float32, -bound, bound
                                    ).astype(jnp.bfloat16),
        "b_qkv": (jax.random.uniform(k2, (1, 3 * dim), jnp.float32, -bound, bound)
                  if qkv_bias else jnp.zeros((1, 3 * dim), jnp.float32)),
        "w_proj": jax.random.uniform(k3, (dim, dim), jnp.float32, -bound, bound
                                     ).astype(jnp.bfloat16),
        "b_proj": jax.random.uniform(k4, (1, dim), jnp.float32, -bound, bound),
        "num_heads": num_heads,
        "scale": (dim // num_heads) ** (-0.5),
    }
    return params


def attention_forward(params, x):
    B, N, C = x.shape
    H = params["num_heads"]

    # qkv projection: M/N/K-tiled Pallas matmul, bf16 activation out.
    qkv = pallas_linear(x.reshape(B * N, C), params["w_qkv"], params["b_qkv"],
                        out_dtype=jnp.bfloat16)
    qkv = qkv.reshape(B, N, 3 * C)          # leading-dim reshape only (no copy)

    # flash-style attention on the packed qkv activation (eval mode, no dropout).
    o = pallas_flash_mha_packed(qkv, num_heads=H, scale=params["scale"])   # (B, N, C) bf16

    # output projection; proj_drop is identity (p = 0).
    out = pallas_linear(o.reshape(B * N, C), params["w_proj"], params["b_proj"],
                        out_dtype=x.dtype)
    return out.reshape(B, N, C)


# ----------------------------------------------------------------------------
# Pure-JAX (f32 math, same bf16 weights) reference for a sanity check
# ----------------------------------------------------------------------------
def attention_reference(params, x):
    B, N, C = x.shape
    H = params["num_heads"]
    Dh = C // H
    w_qkv = params["w_qkv"].astype(jnp.float32)
    w_proj = params["w_proj"].astype(jnp.float32)
    qkv = x @ w_qkv + params["b_qkv"][0]
    qkv = qkv.reshape(B, N, 3, H, Dh)
    q, k, v = qkv[:, :, 0], qkv[:, :, 1], qkv[:, :, 2]          # (B, N, H, Dh)
    s = jnp.einsum("bnhd,bmhd->bhnm", q, k) * params["scale"]
    p = jax.nn.softmax(s, axis=-1)
    o = jnp.einsum("bhnm,bmhd->bnhd", p, v).reshape(B, N, C)
    return o @ w_proj + params["b_proj"][0]


if __name__ == "__main__":
    key = jax.random.PRNGKey(0)
    k_param, k_x = jax.random.split(key)

    B, N, C, H = 2, 128, 128, 8
    params = init_attention_params(k_param, C, num_heads=H, qkv_bias=False)
    x = jax.random.normal(k_x, (B, N, C), jnp.float32)

    out = jax.block_until_ready(attention_forward(params, x))
    ref = attention_reference(params, x)

    assert out.shape == (B, N, C)
    # bf16 weights + bf16 HBM activations with f32 accumulation -> loose tolerance.
    max_err = float(jnp.max(jnp.abs(out - ref)))
    assert jnp.allclose(out, ref, atol=5e-2, rtol=5e-2), max_err

    print("KERNEL_OK")
</pallas_src>

<mosaic_0001>
module attributes {stable_mosaic.version = 11 : i64} {
  func.func @_linear_kernel(%arg0: i32, %arg1: i32, %arg2: i32, %arg3: memref<256x128xf32, #tpu.memory_space<vmem>>, %arg4: memref<128x256xbf16, #tpu.memory_space<vmem>>, %arg5: memref<1x256xf32, #tpu.memory_space<vmem>>, %arg6: memref<256x256xbf16, #tpu.memory_space<vmem>>, %arg7: memref<256x256xf32, #tpu.memory_space<vmem>>) attributes {dimension_semantics = [#tpu.dimension_semantics<parallel>, #tpu.dimension_semantics<parallel>, #tpu.dimension_semantics<arbitrary>], iteration_bounds = array<i64: 1, 2, 1>, scalar_prefetch = 0 : i64, scratch_operands = 1 : i64, tpu.core_type = #tpu.core_type<tc>, window_params = [{transform_indices = @transform_0, window_bounds = array<i64: 256, 128>}, {transform_indices = @transform_1, window_bounds = array<i64: 128, 256>}, {transform_indices = @transform_2, window_bounds = array<i64: 1, 256>}, {transform_indices = @transform_3, window_bounds = array<i64: 256, 256>}]} {
    %c0_i32 = arith.constant 0 : i32
    %0 = arith.cmpi eq, %arg2, %c0_i32 : i32
    %1 = arith.extui %0 : i1 to i32
    %c0_i32_0 = arith.constant 0 : i32
    %2 = arith.cmpi ne, %1, %c0_i32_0 : i32
    scf.if %2 {
      %cst_10 = arith.constant 0.000000e+00 : f32
      %13 = vector.broadcast %cst_10 : f32 to vector<256x256xf32>
      %c0_11 = arith.constant 0 : index
      %c0_12 = arith.constant 0 : index
      %14 = vector.load %arg7[%c0_11, %c0_12] : memref<256x256xf32, #tpu.memory_space<vmem>>, vector<256x256xf32>
      tpu.vector_store %arg7[%c0_11, %c0_12], %13 {strides = array<i32>} : memref<256x256xf32, #tpu.memory_space<vmem>>, vector<256x256xf32>,
    } else {
    }
    %c0 = arith.constant 0 : index
    %c0_1 = arith.constant 0 : index
    %3 = vector.load %arg3[%c0, %c0_1] : memref<256x128xf32, #tpu.memory_space<vmem>>, vector<256x128xf32>
    %c0_2 = arith.constant 0 : index
    %c0_3 = arith.constant 0 : index
    %4 = vector.load %arg4[%c0_2, %c0_3] : memref<128x256xbf16, #tpu.memory_space<vmem>>, vector<128x256xbf16>
    %5 = arith.truncf %3 : vector<256x128xf32> to vector<256x128xbf16>
    %c0_4 = arith.constant 0 : index
    %c0_5 = arith.constant 0 : index
    %6 = vector.load %arg7[%c0_4, %c0_5] : memref<256x256xf32, #tpu.memory_space<vmem>>, vector<256x256xf32>
    %cst = arith.constant dense<0.000000e+00> : vector<256x256xf32>
    %7 = tpu.matmul %5, %4, %cst {dimension_numbers = #tpu.dot_dimension_numbers<[1], [0], [0], [1], [0, 0, 1, 1], [], []>} : vector<256x128xbf16>, vector<128x256xbf16>, vector<256x256xf32> -> vector<256x256xf32>
    %8 = arith.addf %6, %7 : vector<256x256xf32>
    %c0_6 = arith.constant 0 : index
    %c0_7 = arith.constant 0 : index
    %9 = vector.load %arg7[%c0_6, %c0_7] : memref<256x256xf32, #tpu.memory_space<vmem>>, vector<256x256xf32>
    tpu.vector_store %arg7[%c0_6, %c0_7], %8 {strides = array<i32>} : memref<256x256xf32, #tpu.memory_space<vmem>>, vector<256x256xf32>,
    %c0_i32_8 = arith.constant 0 : i32
    %10 = arith.cmpi eq, %arg2, %c0_i32_8 : i32
    %11 = arith.extui %10 : i1 to i32
    %c0_i32_9 = arith.constant 0 : i32
    %12 = arith.cmpi ne, %11, %c0_i32_9 : i32
    scf.if %12 {
      %c0_10 = arith.constant 0 : index
      %c0_11 = arith.constant 0 : index
      %13 = vector.load %arg7[%c0_10, %c0_11] : memref<256x256xf32, #tpu.memory_space<vmem>>, vector<256x256xf32>
      %c0_12 = arith.constant 0 : index
      %c0_13 = arith.constant 0 : index
      %14 = vector.load %arg5[%c0_12, %c0_13] : memref<1x256xf32, #tpu.memory_space<vmem>>, vector<1x256xf32>
      %15 = vector.broadcast %14 : vector<1x256xf32> to vector<256x256xf32>
      %16 = arith.addf %13, %15 : vector<256x256xf32>
      %17 = arith.truncf %16 : vector<256x256xf32> to vector<256x256xbf16>
      %c0_14 = arith.constant 0 : index
      %c0_15 = arith.constant 0 : index
      %18 = vector.load %arg6[%c0_14, %c0_15] : memref<256x256xbf16, #tpu.memory_space<vmem>>, vector<256x256xbf16>
      tpu.vector_store %arg6[%c0_14, %c0_15], %17 {strides = array<i32>} : memref<256x256xbf16, #tpu.memory_space<vmem>>, vector<256x256xbf16>,
    } else {
    }
    return
  }
  func.func @transform_0(%arg0: i32, %arg1: i32, %arg2: i32) -> (i32, i32) {
    %c0_i32 = arith.constant 0 : i32
    return %arg0, %arg2 : i32, i32
  }
  func.func @transform_1(%arg0: i32, %arg1: i32, %arg2: i32) -> (i32, i32) {
    %c0_i32 = arith.constant 0 : i32
    return %arg2, %arg1 : i32, i32
  }
  func.func @transform_2(%arg0: i32, %arg1: i32, %arg2: i32) -> (i32, i32) {
    %c0_i32 = arith.constant 0 : i32
    %c0_i32_0 = arith.constant 0 : i32
    return %c0_i32, %arg1 : i32, i32
  }
  func.func @transform_3(%arg0: i32, %arg1: i32, %arg2: i32) -> (i32, i32) {
    %c0_i32 = arith.constant 0 : i32
    return %arg0, %arg1 : i32, i32
  }
}

</mosaic_0001>

<bundles_post_ra>
// kernel: tpu_custom_call.1
= control target key start
LH: loop header
LB: loop body
LE: loop exit
PB: predicated region body
PF: predicated region fallthrough
CT: control target
= control target key end

     0   :  { %8 = vsyncpa [#allocation4], 0  ;;  %s2190_s0 = inlined_call_operand.hbm [shape: f32[256,128], index: 0, kind: input, shape index: {}]   ;;  %s2191_s1 = inlined_call_operand.hbm [shape: bf16[128,384], index: 1, kind: input, shape index: {}]   ;;  %s2192_s2 = inlined_call_operand.vmem [shape: f32[1,384], index: 2, kind: input, shape index: {}]   ;;  %s2193_s3 = inlined_call_operand.hbm [shape: bf16[256,384], index: 3, kind: output, shape index: {}]  }
   0x1   :  { %9 = vsyncpa [#allocation7], 0 }
   0x2   :  { %11 = vsyncpa [#allocation7 + $0x1], 0 }
   0x3   :  { %12 = vsyncpa [#allocation5], 0 }
   0x4   :  { %14 = vsyncpa [#allocation5 + $0x1], 0  ;;  %s1805_s12 = smov 0   ;;  %s1807_s13 = smov 0  }
   0x5   :  { %s1809_s14 = smov 0   ;;  %s1811_s15 = smov 0  }
   0x6   :  { %s1813_s16 = smov 0   ;;  %s1815_s17 = smov 0  }
   0x7 LB: > { %s1404_s18 = sadd.s32 4294967295, %s1773_s17   ;;  %s1405_s19 = sadd.s32 4294967294, %s1773_s17   ;;  %s1773_s17 = sphi %s1815_s17, %s20_s17   ;;  %s1769_s16 = sphi %s1813_s16, %s2215_s16   ;;  %s1765_s15 = sphi %s1811_s15, %s2214_s15   ;;  %s1761_s14 = sphi %s1809_s14, %s2213_s14   ;;  %s1757_s13 = sphi %s1807_s13, %s2212_s13   ;;  %s1753_s12 = sphi %s1805_s12, %s2211_s12  }
   0x8   : > { %s35_s20 = sadd.s32 1, %s1769_s16  ;;  %s76_s21 = sadd.s32 1, %s1761_s14 }
   0x9   : > { %p37_p0 = scmp.ge.s32.totalorder %s35_s20, 2  ;;  %p83_p1 = scmp.ne.s32.totalorder %s1761_s14, %s1757_s13 }
   0xa   : > { %p84_p2 = scmp.eq.s32.totalorder %s1773_s17, 0  ;;  %p89_p3 = scmp.ne.s32.totalorder %s1757_s13, %s1753_s12 }
   0xb   : > { %s2217_s20 = smov (%p37_p0, %s35_s20), 0  ;;  %p1850_p5 = scmp.eq.s32.totalorder %s1404_s18, 0 }
   0xc   : > { %p1846_p4 = por %p84_p2, %p83_p1  ;;  %s72_s24 = ssub.s32 %s1769_s16, %s2217_s20 }
   0xd   : > { %s2199_s23 = scalar_select %p1850_p5, 1, 0 }
   0xe   : > { %s2198_s22 = scalar_select %p1846_p4, 1, 0 }
   0xf   : > { %p141_p6 = scmp.eq.s32.totalorder %s1404_s18, 1  ;;  %p74_p7 = scmp.eq.s32.totalorder %s72_s24, 0 }
  0x10   : > { %p1858_p8 = por %p1850_p5, %p89_p3  ;;  %p147_p10 = scmp.eq.s32.totalorder %s1405_s19, 1 }
  0x11   : > { %p1862_p9 = por %p141_p6, %p83_p1  ;;  %p1406_p12 = scmp.ge.s32.totalorder %s1773_s17, 1 }
  0x12   : > { %s2200_s25 = scalar_select %p1858_p8, 1, 0 }
  0x13   : > { %s2201_s26 = scalar_select %p1862_p9, 1, 0 }
  0x14   : > { %s1867_s27 = scalar_select %p74_p7, %s1761_s14, %s76_s21  }
  0x15   : > { %p1869_p11 = por %p147_p10, %p89_p3  ;;  %p154_p13 = scmp.lt.s32.totalorder %s1773_s17, 3 }
  0x16   : > { %s1775_s30 = smov [#allocation3]   ;;  %s1631_s8 = scalar_lea.hbm %s2190_s0, 4096 }
  0x17   : > { %s2202_s28 = scalar_select %p1869_p11, 1, 0 }
  0x18   : > { %p1875_p0 = pnand %p1406_p12, %p154_p13  ;;  %s170_s4 = sshll.u32 %s1775_s30, 4  ;;  %s171_s4 = int_to_ptr.vmem [resolvable:$true] %s170_s4 }
  0x19   : > { %p1632_p3 = scmp.ne.s32.totalorder %s2190_s0, %s1631_s8  ;;  %p1638_p12 = scmp.lt.u32.totalorder %s1631_s8, %s2190_s0 }
  0x1a   : > { %s2203_s29 = scalar_select %p1875_p0, 1, 0 }
  0x1b   : > { %p1540_p1 = pneg %p1875_p0 }
  0x1d   : > { %p1883_p2 = pnand %p1540_p1, %p1850_p5 }
  0x1f   : > { %p1633_p6 = pneg %p1883_p2 }
  0x21   : > { %p1634_p7 = pnand %p1633_p6, %p1632_p3 }
  0x23   : > { %p1635_p10 = pneg %p1634_p7 }
  0x25   : > { %p1640_p13 = pnand %p1638_p12, %p1635_p10 }
  0x27   : > { %1643 = shalt.err (!%p1640_p13)
}
  0x28   : > { %s1644_s19 = scalar_lea.vmem %s171_s4, 4096  ;;  %p1652_p8 = scmp.lt.s32.totalorder %s171_s4, %s171_s4 }
  0x29   : > { %p1645_p1 = scmp.ne.s32.totalorder %s171_s4, %s1644_s19  ;;  %p1653_p5 = scmp.lt.s32.totalorder %s1644_s19, %s1644_s19 }
  0x2b   : > { %p1647_p11 = pnand %p1645_p1, %p1633_p6  ;;  %p1654_p0 = por %p1653_p5, %p1652_p8 }
  0x2d   : > { %p1648_p9 = pneg %p1647_p11 }
  0x2f   : > { %p1655_p4 = pnand %p1654_p0, %p1648_p9 }
  0x31   : > { %1658 = shalt.err (!%p1655_p4)
}
  0x32   : > { %s1776_s21 = smov 128   ;;  %s1777_s24 = smov 8  }
  0x33   : > { %1543 = dma.hbm_to_vmem [thread:$0]  (!%p1883_p2), %s2190_s0, 4096, %s171_s4, [#allocation4], %s1776_s21, %s1776_s21, %s1777_s24  }
  0x34   : > { %p1408_p3 = scmp.ge.s32.totalorder %s1773_s17, 2 }
  0x35   : > { %p2205_p11 = scmp.ne.s32.totalorder (!%p1408_p3), %s2198_s22, 0 }
  0x36   : > { %180 = sbr.rel (%p1408_p3) target bundleno = 96 (0x60), region = 20 }
  0x3d   : > { %183 = sbr.rel (!%p2205_p11) target bundleno = 96 (0x60), region = 24  ;;  %s184_s7 = sand.u32 (%p2205_p11), 1, %s1761_s14  }
  0x3e   : > { %s1410_s8 = sshll.u32 (%p2205_p11), %s1769_s16, 1  ;;  %s1409_s9 = sshll.u32 (%p2205_p11), %s184_s7, 7 }
  0x3f   : > { %s191_s10 = ssub.s32 (%p2205_p11), 3, %s1410_s8  ;;  %s1916_s11 = scalar_lea.sflag (%p2205_p11), [#allocation7], %s184_s7 }
  0x40   : > { %p192_p4 = scmp.lt.s32.totalorder (%p2205_p11), %s191_s10, 2  ;;  %s188_s18 = scalar_lea.vmem (%p2205_p11), [#allocation6], %s1409_s9 }
  0x44   : > { %s2219_s10 = smov (!%p192_p4, %s191_s10), 2 }
  0x45   : > { %s1913_s5 = sshll.u32 %s2219_s10, 10 }
  0x46   : > { %s196_s4 = ssub.s32 2048, %s1913_s5 }
  0x47   : > { %197 = vsyncadd %s1916_s11, %s196_s4  ;;  %p1412_p5 = scmp.ne.s32.totalorder %s1913_s5, 0  ;;  %s1480_s22 = sshll.u32 %s1769_s16, 7 }
  0x48   : > { %s1924_s24 = scalar_lea.hbm %s2191_s1, %s1480_s22  ;;  %s1414_s30 = sshll.u32 %s2219_s10, 2 }
  0x49   : > { %s205_s6 = sshll.u32 %s188_s18, 4  ;;  %s1659_s7 = scalar_lea.hbm %s1924_s24, %s1913_s5  ;;  %s1927_s6 = int_to_ptr.vmem [resolvable:$true] %s205_s6 }
  0x4a   : > { %p1660_p8 = scmp.ne.s32.totalorder %s1924_s24, %s1659_s7  ;;  %s1663_s4 = scalar_lea.hbm %s2191_s1, 3072 }
  0x4b   : > { %p1664_p2 = scmp.lt.u32.totalorder %s1924_s24, %s2191_s1  ;;  %p1665_p6 = scmp.lt.u32.totalorder %s1663_s4, %s1659_s7 }
  0x4c   : > { %p1661_p9 = pnand %p1660_p8, %p1412_p5  ;;  %p1667_p10 = scmp.lt.u32.totalorder %s1659_s7, %s1924_s24 }
  0x4d   : > { %p1666_p7 = por %p1665_p6, %p1664_p2 }
  0x4e   : > { %p1662_p0 = pneg %p1661_p9 }
  0x4f   : > { %p1668_p12 = por %p1667_p10, %p1666_p7 }
  0x51   : > { %p1669_p13 = pnand %p1668_p12, %p1662_p0 }
  0x53   : > { %1672 = shalt.err (!%p1669_p13)
}
  0x54   : > { %s1673_s18 = scalar_lea.vmem %s1927_s6, %s1913_s5  ;;  %s1778_s21 = smov [#allocation6]  }
  0x55   : > { %p1674_p1 = scmp.ne.s32.totalorder %s1927_s6, %s1673_s18  ;;  %s1677_s8 = sshll.u32 %s1778_s21, 4  ;;  %s1678_s8 = int_to_ptr.vmem [resolvable:$false] %s1677_s8 }
  0x56   : > { %s1679_s9 = scalar_lea.vmem %s1678_s8, 4096  ;;  %p1680_p8 = scmp.lt.s32.totalorder %s1927_s6, %s1678_s8 }
  0x57   : > { %p1675_p11 = pnand %p1674_p1, %p1412_p5  ;;  %p1681_p9 = scmp.lt.s32.totalorder %s1679_s9, %s1673_s18 }
  0x59   : > { %p1676_p4 = pneg %p1675_p11  ;;  %p1682_p2 = por %p1681_p9, %p1680_p8 }
  0x5b   : > { %p1683_p6 = pnand %p1682_p2, %p1676_p4 }
  0x5d   : > { %1686 = shalt.err (!%p1683_p6)
}
  0x5e   : > { %s1779_s7 = smov 192   ;;  %s1780_s4 = smov 128  }
  0x5f   : > { %211 = dma.hbm_to_vmem [thread:$0]  (%p1412_p5), %s1924_s24, %s1913_s5, %s1927_s6, %s1916_s11, %s1779_s7, %s1780_s4, %s1414_s30  }
  0x60 PF: > { %p2206_p0 = scmp.ne.s32.totalorder %s2203_s29, 0 }
  0x61   : > { %p2207_p7 = scmp.ne.s32.totalorder (!%p2206_p0), %s2199_s23, 0 }
  0x62   : > { %233 = sbr.rel (%p2206_p0) target bundleno = 449 (0x1c1), region = 32 }
  0x69   : > { %1740 = dma.done.wait (%p2207_p7), [#allocation4], 4096  }
  0x6a   : > { %1742 = vsyncadd (%p2207_p7), [#allocation4], 4294963200  ;;  %s1963_s19 = sand.u32 1, %s1757_s13   ;;  %p2208_p5 = scmp.ne.s32.totalorder %s2200_s25, 0 }
  0x6b   : > { %s1419_s22 = sshll.u32 %s1963_s19, 7  ;;  %s240_s10 = scalar_lea.sflag [#allocation7], %s1963_s19 }
  0x6c   : > { %s1967_s5 = scalar_lea.vmem [#allocation6], %s1419_s22 }
  0x6d   : > { %1744 = dma.done.wait (%p2208_p5), %s240_s10, 2048  }
  0x6e   : > { %1746 = vsyncadd (%p2208_p5), %s240_s10, 4294965248  ;;  %v1781_v0 = vmov 0   ;;  %v1607_v1 = vld [vmem:[%s1967_s5 + $0x4] ss:$8 sps:$4 sm:$0xff]   ;;  %v1609_v2 = vld [vmem:[%s1967_s5] ss:$8 sps:$4 sm:$0xff]  }
  0x6f   : > { %609 = vmatprep.mubr.bf16.mxu0 %v1781_v0  ;;  %689 = vmatprep.mubr.bf16.mxu1 %v1781_v0  ;;  %v1610_v3 = vld [vmem:[%s1967_s5 + $0x14] ss:$8 sps:$4 sm:$0xff]   ;;  %v1612_v4 = vld [vmem:[%s1967_s5 + $0x10] ss:$8 sps:$4 sm:$0xff]   ;;  %v1613_v5 = vld [vmem:[%s1967_s5 + $0x24] ss:$8 sps:$4 sm:$0xff]  }
  0x70   : > { %577 = vmatprep.subr.bf16.mxu0 %v1607_v1  ;;  %1518 = vmatprep.subr.bf16.mxu1 %v1607_v1  ;;  %v1615_v6 = vld [vmem:[%s1967_s5 + $0x20] ss:$8 sps:$4 sm:$0xff]   ;;  %v1616_v7 = vld [vmem:[%s1967_s5 + $0x34] ss:$8 sps:$4 sm:$0xff]   ;;  %v1618_v8 = vld [vmem:[%s1967_s5 + $0x30] ss:$8 sps:$4 sm:$0xff]  }
  0x71   : > { %578 = vmatpush1.bf16.msra.mxu0 %v1609_v2  ;;  %1526 = vmatpush1.bf16.msra.mxu1 %v1609_v2  ;;  %v1619_v9 = vld [vmem:[%s1967_s5 + $0x44] ss:$8 sps:$4 sm:$0xff]   ;;  %v1621_v10 = vld [vmem:[%s1967_s5 + $0x40] ss:$8 sps:$4 sm:$0xff]   ;;  %v1622_v11 = vld [vmem:[%s1967_s5 + $0x54] ss:$8 sps:$4 sm:$0xff]   ;;  %v967_v2 = vlaneseq }
  0x72   : > { %579 = vmatprep.subr.bf16.mxu0 %v1610_v3  ;;  %1519 = vmatprep.subr.bf16.mxu1 %v1610_v3  ;;  %v1624_v12 = vld [vmem:[%s1967_s5 + $0x50] ss:$8 sps:$4 sm:$0xff]   ;;  %v1625_v13 = vld [vmem:[%s1967_s5 + $0x64] ss:$8 sps:$4 sm:$0xff]   ;;  %v1627_v14 = vld [vmem:[%s1967_s5 + $0x60] ss:$8 sps:$4 sm:$0xff]  }
  0x73   : > { %v1628_v15 = vld [vmem:[%s1967_s5 + $0x74] ss:$8 sps:$4 sm:$0xff]   ;;  %v1630_v16 = vld [vmem:[%s1967_s5 + $0x70] ss:$8 sps:$4 sm:$0xff]   ;;  %v369_v17 = vld [vmem:[#allocation3] sm:$0xff]  ;;  %s2006_s23 = sshll.u32 %s1765_s15, 1 }
  0x74   : > { %v370_v18 = vld [vmem:[#allocation3 + $0x8] sm:$0xff]  ;;  %v385_v19 = vld [vmem:[#allocation3 + $0x80] sm:$0xff]  ;;  %v371_v23 = vld [vmem:[#allocation3 + $0x10] sm:$0xff]  ;;  %p286_p10 = scmp.lt.s32.totalorder %s2006_s23, 2  ;;  %v968_v3 = vshrl.u32 %v967_v2, 7  ;;  %s1420_s30 = sshll.u32 %s1963_s19, 8 }
  0x75   : > { %580 = vmatpush1.bf16.msra.mxu0 %v1612_v4  ;;  %1527 = vmatpush1.bf16.msra.mxu1 %v1612_v4  ;;  %v386_v20 = vld [vmem:[#allocation3 + $0x88] sm:$0xff]  ;;  %v417_v21 = vpack.c.bf16 %v370_v18, %v369_v17  ;;  %v372_v24 = vld [vmem:[#allocation3 + $0x18] sm:$0xff]  ;;  %v387_v25 = vld [vmem:[#allocation3 + $0x90] sm:$0xff]  ;;  %s2026_s6 = scalar_lea.vmem [#allocation8], %s1420_s30  ;;  %s1266_s18 = scalar_lea.sflag [#allocation5], %s1963_s19 }
  0x76   : > { %581 = vmatprep.subr.bf16.mxu0 %v1613_v5  ;;  %1520 = vmatprep.subr.bf16.mxu1 %v1613_v5  ;;  %v425_v22 = vpack.c.bf16 %v386_v20, %v385_v19  ;;  %v388_v26 = vld [vmem:[#allocation3 + $0x98] sm:$0xff]  ;;  %v418_v27 = vpack.c.bf16 %v372_v24, %v371_v23  ;;  %v373_v29 = vld [vmem:[#allocation3 + $0x20] sm:$0xff]  ;;  %v374_v30 = vld [vmem:[#allocation3 + $0x28] sm:$0xff]  ;;  %s287_s25 = scalar_select %p286_p10, %s2006_s23, 2  ;;  %v973_v5 = vsub.s32 1, %v968_v3 }
  0x77   : > { %v426_v28 = vpack.c.bf16 %v388_v26, %v387_v25  ;;  %v389_v31 = vld [vmem:[#allocation3 + $0xa0] sm:$0xff]  ;;  %v390_v32 = vld [vmem:[#allocation3 + $0xa8] sm:$0xff]  ;;  %v419_v33 = vpack.c.bf16 %v374_v30, %v373_v29  ;;  %v375_v35 = vld [vmem:[#allocation3 + $0x30] sm:$0xff]  ;;  %p2209_p12 = scmp.ne.s32.totalorder %s2201_s26, 0 }
  0x78   : > { %v427_v34 = vpack.c.bf16 %v390_v32, %v389_v31  ;;  %v376_v36 = vld [vmem:[#allocation3 + $0x38] sm:$0xff]  ;;  %v391_v37 = vld [vmem:[#allocation3 + $0xb0] sm:$0xff]  ;;  %v377_v41 = vld [vmem:[#allocation3 + $0x40] sm:$0xff]  ;;  %s288_s24 = scalar_lea.vmem %s2192_s2, %s287_s25  ;;  %s1275_s21 = ssub.s32 (%p2209_p12), 3, %s2006_s23 }
  0x79   : > { %582 = vmatpush1.bf16.msra.mxu0 %v1615_v6  ;;  %1528 = vmatpush1.bf16.msra.mxu1 %v1615_v6  ;;  %v392_v38 = vld [vmem:[#allocation3 + $0xb8] sm:$0xff]  ;;  %v420_v39 = vpack.c.bf16 %v376_v36, %v375_v35  ;;  %v378_v42 = vld [vmem:[#allocation3 + $0x48] sm:$0xff]  ;;  %v393_v43 = vld [vmem:[#allocation3 + $0xc0] sm:$0xff]  ;;  %p1276_p13 = scmp.lt.s32.totalorder (%p2209_p12), %s1275_s21, 2 }
  0x7a   : > { %583 = vmatprep.subr.bf16.mxu0 %v1616_v7  ;;  %1521 = vmatprep.subr.bf16.mxu1 %v1616_v7  ;;  %v428_v40 = vpack.c.bf16 %v392_v38, %v391_v37  ;;  %v394_v44 = vld [vmem:[#allocation3 + $0xc8] sm:$0xff]  ;;  %v421_v45 = vpack.c.bf16 %v378_v42, %v377_v41  ;;  %v379_v47 = vld [vmem:[#allocation3 + $0x50] sm:$0xff]  ;;  %v380_v48 = vld [vmem:[#allocation3 + $0x58] sm:$0xff] }
  0x7b   : > { %v429_v46 = vpack.c.bf16 %v394_v44, %v393_v43  ;;  %v395_v49 = vld [vmem:[#allocation3 + $0xd0] sm:$0xff]  ;;  %v396_v50 = vld [vmem:[#allocation3 + $0xd8] sm:$0xff]  ;;  %v422_v51 = vpack.c.bf16 %v380_v48, %v379_v47  ;;  %v381_v53 = vld [vmem:[#allocation3 + $0x60] sm:$0xff] }
  0x7c   : > { %v430_v52 = vpack.c.bf16 %v396_v50, %v395_v49  ;;  %v382_v54 = vld [vmem:[#allocation3 + $0x68] sm:$0xff]  ;;  %v397_v55 = vld [vmem:[#allocation3 + $0xe0] sm:$0xff]  ;;  %v383_v59 = vld [vmem:[#allocation3 + $0x70] sm:$0xff] }
  0x7d   : > { %584 = vmatpush1.bf16.msra.mxu0 %v1618_v8  ;;  %1529 = vmatpush1.bf16.msra.mxu1 %v1618_v8  ;;  %v398_v56 = vld [vmem:[#allocation3 + $0xe8] sm:$0xff]  ;;  %v423_v57 = vpack.c.bf16 %v382_v54, %v381_v53  ;;  %v384_v60 = vld [vmem:[#allocation3 + $0x78] sm:$0xff]  ;;  %v399_v61 = vld [vmem:[#allocation3 + $0xf0] sm:$0xff] }
  0x7e   : > { %585 = vmatprep.subr.bf16.mxu0 %v1619_v9  ;;  %1522 = vmatprep.subr.bf16.mxu1 %v1619_v9  ;;  %v431_v58 = vpack.c.bf16 %v398_v56, %v397_v55  ;;  %v400_v62 = vld [vmem:[#allocation3 + $0xf8] sm:$0xff]  ;;  %v424_v63 = vpack.c.bf16 %v384_v60, %v383_v59  ;;  %v965_v4 = vld [vmem:[%s288_s24] sm:$0x3] }
  0x7f   : > { %v432_v1 = vpack.c.bf16 %v400_v62, %v399_v61  ;;  %v2015_v7 = vrot.slane %v965_v4, %v973_v5 }
  0x81   : > { %586 = vmatpush1.bf16.msra.mxu0 %v1621_v10  ;;  %1530 = vmatpush1.bf16.msra.mxu1 %v1621_v10 }
  0x82   : > { %587 = vmatprep.subr.bf16.mxu0 %v1622_v11  ;;  %1523 = vmatprep.subr.bf16.mxu1 %v1622_v11 }
  0x85   : > { %588 = vmatpush1.bf16.msra.mxu0 %v1624_v12  ;;  %1531 = vmatpush1.bf16.msra.mxu1 %v1624_v12 }
  0x86   : > { %589 = vmatprep.subr.bf16.mxu0 %v1625_v13  ;;  %1524 = vmatprep.subr.bf16.mxu1 %v1625_v13 }
  0x89   : > { %590 = vmatpush1.bf16.msra.mxu0 %v1627_v14  ;;  %1532 = vmatpush1.bf16.msra.mxu1 %v1627_v14 }
  0x8a   : > { %591 = vmatprep.subr.bf16.mxu0 %v1628_v15  ;;  %1525 = vmatprep.subr.bf16.mxu1 %v1628_v15 }
  0x8d   : > { %592 = vmatpush1.bf16.msra.mxu0 %v1630_v16  ;;  %1533 = vmatpush1.bf16.msra.mxu1 %v1630_v16 }
  0x90   : > { %610 = vmatmul.mubr.bf16.vlgmr.msra.gmra.mrb[0].mxu0 %v417_v21  ;;  %690 = vmatmul.mubr.bf16.vlgmr.msra.gmra.mrb[0].mxu1 %v425_v22 }
  0x91   : > { %619 = vmatprep.mubr.bf16.mxu0 %v1781_v0  ;;  %699 = vmatprep.mubr.bf16.mxu1 %v1781_v0 }
  0x98   : > { %620 = vmatmul.mubr.bf16.gmra.mrb[4].mxu0 %v418_v27  ;;  %700 = vmatmul.mubr.bf16.gmra.mrb[4].mxu1 %v426_v28 }
  0x99   : > { %629 = vmatprep.mubr.bf16.mxu0 %v1781_v0  ;;  %709 = vmatprep.mubr.bf16.mxu1 %v1781_v0 }
  0xa0   : > { %630 = vmatmul.mubr.bf16.gmra.mrb[8].mxu0 %v419_v33  ;;  %710 = vmatmul.mubr.bf16.gmra.mrb[8].mxu1 %v427_v34 }
  0xa1   : > { %639 = vmatprep.mubr.bf16.mxu0 %v1781_v0  ;;  %719 = vmatprep.mubr.bf16.mxu1 %v1781_v0 }
  0xa8   : > { %640 = vmatmul.mubr.bf16.gmra.mrb[12].mxu0 %v420_v39  ;;  %720 = vmatmul.mubr.bf16.gmra.mrb[12].mxu1 %v428_v40 }
  0xa9   : > { %649 = vmatprep.mubr.bf16.mxu0 %v1781_v0  ;;  %729 = vmatprep.mubr.bf16.mxu1 %v1781_v0 }
  0xb0   : > { %650 = vmatmul.mubr.bf16.gmra.mrb[16].mxu0 %v421_v45  ;;  %730 = vmatmul.mubr.bf16.gmra.mrb[16].mxu1 %v429_v46 }
  0xb1   : > { %659 = vmatprep.mubr.bf16.mxu0 %v1781_v0  ;;  %739 = vmatprep.mubr.bf16.mxu1 %v1781_v0 }
  0xb8   : > { %660 = vmatmul.mubr.bf16.gmra.mrb[20].mxu0 %v422_v51  ;;  %740 = vmatmul.mubr.bf16.gmra.mrb[20].mxu1 %v430_v52 }
  0xb9   : > { %669 = vmatprep.mubr.bf16.mxu0 %v1781_v0  ;;  %749 = vmatprep.mubr.bf16.mxu1 %v1781_v0 }
  0xc0   : > { %670 = vmatmul.mubr.bf16.gmra.mrb[24].mxu0 %v423_v57  ;;  %750 = vmatmul.mubr.bf16.gmra.mrb[24].mxu1 %v431_v58 }
  0xc1   : > { %679 = vmatprep.mubr.bf16.mxu0 %v1781_v0  ;;  %759 = vmatprep.mubr.bf16.mxu1 %v1781_v0  ;;  %v969_v0 = vsub.s32 0, %v968_v3 }
  0xc3   : > { %v2013_v6 = vrot.slane %v965_v4, %v969_v0 }
  0xc8   : > { %680 = vmatmul.mubr.bf16.gmra.mrb[28].mxu0 %v424_v63  ;;  %760 = vmatmul.mubr.bf16.gmra.mrb[28].mxu1 %v432_v1 }
 0x163   : > { %v611_v8 = vpop.f32.mrb[0].mxu0  ;;  %v691_v9 = vpop.f32.mrb[0].mxu1 }
 0x164   : > { %v977_v10 = vadd.f32 %v2013_v6, %v611_v8  ;;  %v1009_v11 = vadd.f32 %v2013_v6, %v691_v9  ;;  %v613_v12 = vpop.f32.mrb[1].mxu0  ;;  %v693_v13 = vpop.f32.mrb[1].mxu1 }
 0x165   : > { %v978_v14 = vadd.f32 %v2015_v7, %v613_v12  ;;  %v1010_v15 = vadd.f32 %v2015_v7, %v693_v13  ;;  %v615_v16 = vpop.f32.mrb[2].mxu0  ;;  %v695_v17 = vpop.f32.mrb[2].mxu1 }
 0x166   : > { %v979_v18 = vadd.f32 %v2013_v6, %v615_v16  ;;  %v1011_v19 = vadd.f32 %v2013_v6, %v695_v17  ;;  %v617_v20 = vpop.f32.mrb[3].mxu0  ;;  %v697_v21 = vpop.f32.mrb[3].mxu1 }
 0x167   : > { %v1483_v22 = vpack.c.bf16 %v978_v14, %v977_v10  ;;  %v1499_v23 = vpack.c.bf16 %v1010_v15, %v1009_v11  ;;  %v980_v24 = vadd.f32 %v2015_v7, %v617_v20  ;;  %v1012_v25 = vadd.f32 %v2015_v7, %v697_v21 }
 0x169   : > { %1233 = vst [vmem:[%s2026_s6] sm:$0xff] %v1483_v22  ;;  %1249 = vst [vmem:[%s2026_s6 + $0x80] sm:$0xff] %v1499_v23  ;;  %v1484_v26 = vpack.c.bf16 %v980_v24, %v979_v18  ;;  %v1500_v27 = vpack.c.bf16 %v1012_v25, %v1011_v19 }
 0x16b   : > { %1234 = vst [vmem:[%s2026_s6 + $0x8] sm:$0xff] %v1484_v26  ;;  %1250 = vst [vmem:[%s2026_s6 + $0x88] sm:$0xff] %v1500_v27  ;;  %v621_v28 = vpop.f32.mrb[4].mxu0  ;;  %v701_v29 = vpop.f32.mrb[4].mxu1 }
 0x16c   : > { %v981_v30 = vadd.f32 %v2013_v6, %v621_v28  ;;  %v1013_v31 = vadd.f32 %v2013_v6, %v701_v29  ;;  %v623_v32 = vpop.f32.mrb[5].mxu0  ;;  %v703_v33 = vpop.f32.mrb[5].mxu1 }
 0x16d   : > { %v982_v34 = vadd.f32 %v2015_v7, %v623_v32  ;;  %v1014_v35 = vadd.f32 %v2015_v7, %v703_v33  ;;  %v625_v36 = vpop.f32.mrb[6].mxu0  ;;  %v705_v37 = vpop.f32.mrb[6].mxu1 }
 0x16e   : > { %v983_v38 = vadd.f32 %v2013_v6, %v625_v36  ;;  %v1015_v39 = vadd.f32 %v2013_v6, %v705_v37  ;;  %v627_v40 = vpop.f32.mrb[7].mxu0  ;;  %v707_v41 = vpop.f32.mrb[7].mxu1 }
 0x16f   : > { %v1485_v42 = vpack.c.bf16 %v982_v34, %v981_v30  ;;  %v1501_v43 = vpack.c.bf16 %v1014_v35, %v1013_v31  ;;  %v984_v44 = vadd.f32 %v2015_v7, %v627_v40  ;;  %v1016_v45 = vadd.f32 %v2015_v7, %v707_v41 }
 0x171   : > { %1235 = vst [vmem:[%s2026_s6 + $0x10] sm:$0xff] %v1485_v42  ;;  %1251 = vst [vmem:[%s2026_s6 + $0x90] sm:$0xff] %v1501_v43  ;;  %v1486_v46 = vpack.c.bf16 %v984_v44, %v983_v38  ;;  %v1502_v47 = vpack.c.bf16 %v1016_v45, %v1015_v39 }
 0x173   : > { %1236 = vst [vmem:[%s2026_s6 + $0x18] sm:$0xff] %v1486_v46  ;;  %1252 = vst [vmem:[%s2026_s6 + $0x98] sm:$0xff] %v1502_v47  ;;  %v631_v48 = vpop.f32.mrb[8].mxu0  ;;  %v711_v49 = vpop.f32.mrb[8].mxu1 }
 0x174   : > { %v985_v50 = vadd.f32 %v2013_v6, %v631_v48  ;;  %v1017_v51 = vadd.f32 %v2013_v6, %v711_v49  ;;  %v633_v52 = vpop.f32.mrb[9].mxu0  ;;  %v713_v53 = vpop.f32.mrb[9].mxu1 }
 0x175   : > { %v986_v54 = vadd.f32 %v2015_v7, %v633_v52  ;;  %v1018_v55 = vadd.f32 %v2015_v7, %v713_v53  ;;  %v635_v56 = vpop.f32.mrb[10].mxu0  ;;  %v715_v57 = vpop.f32.mrb[10].mxu1 }
 0x176   : > { %v987_v58 = vadd.f32 %v2013_v6, %v635_v56  ;;  %v1019_v59 = vadd.f32 %v2013_v6, %v715_v57  ;;  %v637_v60 = vpop.f32.mrb[11].mxu0  ;;  %v717_v61 = vpop.f32.mrb[11].mxu1 }
 0x177   : > { %v1487_v62 = vpack.c.bf16 %v986_v54, %v985_v50  ;;  %v1503_v63 = vpack.c.bf16 %v1018_v55, %v1017_v51  ;;  %v988_v1 = vadd.f32 %v2015_v7, %v637_v60  ;;  %v1020_v2 = vadd.f32 %v2015_v7, %v717_v61 }
 0x179   : > { %1237 = vst [vmem:[%s2026_s6 + $0x20] sm:$0xff] %v1487_v62  ;;  %1253 = vst [vmem:[%s2026_s6 + $0xa0] sm:$0xff] %v1503_v63  ;;  %v1488_v3 = vpack.c.bf16 %v988_v1, %v987_v58  ;;  %v1504_v0 = vpack.c.bf16 %v1020_v2, %v1019_v59 }
 0x17b   : > { %1238 = vst [vmem:[%s2026_s6 + $0x28] sm:$0xff] %v1488_v3  ;;  %1254 = vst [vmem:[%s2026_s6 + $0xa8] sm:$0xff] %v1504_v0  ;;  %v641_v4 = vpop.f32.mrb[12].mxu0  ;;  %v721_v5 = vpop.f32.mrb[12].mxu1 }
 0x17c   : > { %v989_v8 = vadd.f32 %v2013_v6, %v641_v4  ;;  %v1021_v9 = vadd.f32 %v2013_v6, %v721_v5  ;;  %v643_v10 = vpop.f32.mrb[13].mxu0  ;;  %v723_v11 = vpop.f32.mrb[13].mxu1 }
 0x17d   : > { %v990_v12 = vadd.f32 %v2015_v7, %v643_v10  ;;  %v1022_v13 = vadd.f32 %v2015_v7, %v723_v11  ;;  %v645_v14 = vpop.f32.mrb[14].mxu0  ;;  %v725_v15 = vpop.f32.mrb[14].mxu1 }
 0x17e   : > { %v991_v16 = vadd.f32 %v2013_v6, %v645_v14  ;;  %v1023_v17 = vadd.f32 %v2013_v6, %v725_v15  ;;  %v647_v18 = vpop.f32.mrb[15].mxu0  ;;  %v727_v19 = vpop.f32.mrb[15].mxu1 }
 0x17f   : > { %v1489_v20 = vpack.c.bf16 %v990_v12, %v989_v8  ;;  %v1505_v21 = vpack.c.bf16 %v1022_v13, %v1021_v9  ;;  %v992_v22 = vadd.f32 %v2015_v7, %v647_v18  ;;  %v1024_v23 = vadd.f32 %v2015_v7, %v727_v19 }
 0x181   : > { %1239 = vst [vmem:[%s2026_s6 + $0x30] sm:$0xff] %v1489_v20  ;;  %1255 = vst [vmem:[%s2026_s6 + $0xb0] sm:$0xff] %v1505_v21  ;;  %v1490_v24 = vpack.c.bf16 %v992_v22, %v991_v16  ;;  %v1506_v25 = vpack.c.bf16 %v1024_v23, %v1023_v17 }
 0x183   : > { %1240 = vst [vmem:[%s2026_s6 + $0x38] sm:$0xff] %v1490_v24  ;;  %1256 = vst [vmem:[%s2026_s6 + $0xb8] sm:$0xff] %v1506_v25  ;;  %v651_v26 = vpop.f32.mrb[16].mxu0  ;;  %v731_v27 = vpop.f32.mrb[16].mxu1 }
 0x184   : > { %v993_v28 = vadd.f32 %v2013_v6, %v651_v26  ;;  %v1025_v29 = vadd.f32 %v2013_v6, %v731_v27  ;;  %v653_v30 = vpop.f32.mrb[17].mxu0  ;;  %v733_v31 = vpop.f32.mrb[17].mxu1 }
 0x185   : > { %v994_v32 = vadd.f32 %v2015_v7, %v653_v30  ;;  %v1026_v33 = vadd.f32 %v2015_v7, %v733_v31  ;;  %v655_v34 = vpop.f32.mrb[18].mxu0  ;;  %v735_v35 = vpop.f32.mrb[18].mxu1 }
 0x186   : > { %v995_v36 = vadd.f32 %v2013_v6, %v655_v34  ;;  %v1027_v37 = vadd.f32 %v2013_v6, %v735_v35  ;;  %v657_v38 = vpop.f32.mrb[19].mxu0  ;;  %v737_v39 = vpop.f32.mrb[19].mxu1 }
 0x187   : > { %v1491_v40 = vpack.c.bf16 %v994_v32, %v993_v28  ;;  %v1507_v41 = vpack.c.bf16 %v1026_v33, %v1025_v29  ;;  %v996_v42 = vadd.f32 %v2015_v7, %v657_v38  ;;  %v1028_v43 = vadd.f32 %v2015_v7, %v737_v39 }
 0x189   : > { %1241 = vst [vmem:[%s2026_s6 + $0x40] sm:$0xff] %v1491_v40  ;;  %1257 = vst [vmem:[%s2026_s6 + $0xc0] sm:$0xff] %v1507_v41  ;;  %v1492_v44 = vpack.c.bf16 %v996_v42, %v995_v36  ;;  %v1508_v45 = vpack.c.bf16 %v1028_v43, %v1027_v37 }
 0x18b   : > { %1242 = vst [vmem:[%s2026_s6 + $0x48] sm:$0xff] %v1492_v44  ;;  %1258 = vst [vmem:[%s2026_s6 + $0xc8] sm:$0xff] %v1508_v45  ;;  %v661_v46 = vpop.f32.mrb[20].mxu0  ;;  %v741_v47 = vpop.f32.mrb[20].mxu1 }
 0x18c   : > { %v997_v48 = vadd.f32 %v2013_v6, %v661_v46  ;;  %v1029_v49 = vadd.f32 %v2013_v6, %v741_v47  ;;  %v663_v50 = vpop.f32.mrb[21].mxu0  ;;  %v743_v51 = vpop.f32.mrb[21].mxu1 }
 0x18d   : > { %v998_v52 = vadd.f32 %v2015_v7, %v663_v50  ;;  %v1030_v53 = vadd.f32 %v2015_v7, %v743_v51  ;;  %v665_v54 = vpop.f32.mrb[22].mxu0  ;;  %v745_v55 = vpop.f32.mrb[22].mxu1 }
 0x18e   : > { %v999_v56 = vadd.f32 %v2013_v6, %v665_v54  ;;  %v1031_v57 = vadd.f32 %v2013_v6, %v745_v55  ;;  %v667_v58 = vpop.f32.mrb[23].mxu0  ;;  %v747_v59 = vpop.f32.mrb[23].mxu1 }
 0x18f   : > { %v1493_v60 = vpack.c.bf16 %v998_v52, %v997_v48  ;;  %v1509_v61 = vpack.c.bf16 %v1030_v53, %v1029_v49  ;;  %v1000_v62 = vadd.f32 %v2015_v7, %v667_v58  ;;  %v1032_v63 = vadd.f32 %v2015_v7, %v747_v59 }
 0x191   : > { %1243 = vst [vmem:[%s2026_s6 + $0x50] sm:$0xff] %v1493_v60  ;;  %1259 = vst [vmem:[%s2026_s6 + $0xd0] sm:$0xff] %v1509_v61  ;;  %v1494_v1 = vpack.c.bf16 %v1000_v62, %v999_v56  ;;  %v1510_v2 = vpack.c.bf16 %v1032_v63, %v1031_v57 }
 0x193   : > { %1244 = vst [vmem:[%s2026_s6 + $0x58] sm:$0xff] %v1494_v1  ;;  %1260 = vst [vmem:[%s2026_s6 + $0xd8] sm:$0xff] %v1510_v2  ;;  %v671_v3 = vpop.f32.mrb[24].mxu0  ;;  %v751_v0 = vpop.f32.mrb[24].mxu1 }
 0x194   : > { %v1001_v4 = vadd.f32 %v2013_v6, %v671_v3  ;;  %v1033_v5 = vadd.f32 %v2013_v6, %v751_v0  ;;  %v673_v8 = vpop.f32.mrb[25].mxu0  ;;  %v753_v9 = vpop.f32.mrb[25].mxu1 }
 0x195   : > { %v1002_v10 = vadd.f32 %v2015_v7, %v673_v8  ;;  %v1034_v11 = vadd.f32 %v2015_v7, %v753_v9  ;;  %v675_v12 = vpop.f32.mrb[26].mxu0  ;;  %v755_v13 = vpop.f32.mrb[26].mxu1 }
 0x196   : > { %v1003_v14 = vadd.f32 %v2013_v6, %v675_v12  ;;  %v1035_v15 = vadd.f32 %v2013_v6, %v755_v13  ;;  %v677_v16 = vpop.f32.mrb[27].mxu0  ;;  %v757_v17 = vpop.f32.mrb[27].mxu1 }
 0x197   : > { %v1495_v18 = vpack.c.bf16 %v1002_v10, %v1001_v4  ;;  %v1511_v19 = vpack.c.bf16 %v1034_v11, %v1033_v5  ;;  %v1004_v20 = vadd.f32 %v2015_v7, %v677_v16  ;;  %v1036_v21 = vadd.f32 %v2015_v7, %v757_v17 }
 0x199   : > { %1245 = vst [vmem:[%s2026_s6 + $0x60] sm:$0xff] %v1495_v18  ;;  %1261 = vst [vmem:[%s2026_s6 + $0xe0] sm:$0xff] %v1511_v19  ;;  %v1496_v22 = vpack.c.bf16 %v1004_v20, %v1003_v14  ;;  %v1512_v23 = vpack.c.bf16 %v1036_v21, %v1035_v15 }
 0x19b   : > { %1246 = vst [vmem:[%s2026_s6 + $0x68] sm:$0xff] %v1496_v22  ;;  %1262 = vst [vmem:[%s2026_s6 + $0xe8] sm:$0xff] %v1512_v23  ;;  %v681_v24 = vpop.f32.mrb[28].mxu0  ;;  %v761_v25 = vpop.f32.mrb[28].mxu1 }
 0x19c   : > { %v1005_v26 = vadd.f32 %v2013_v6, %v681_v24  ;;  %v1037_v27 = vadd.f32 %v2013_v6, %v761_v25  ;;  %v683_v28 = vpop.f32.mrb[29].mxu0  ;;  %v763_v29 = vpop.f32.mrb[29].mxu1 }
 0x19d   : > { %v1006_v30 = vadd.f32 %v2015_v7, %v683_v28  ;;  %v1038_v31 = vadd.f32 %v2015_v7, %v763_v29  ;;  %v685_v32 = vpop.f32.mrb[30].mxu0  ;;  %v765_v33 = vpop.f32.mrb[30].mxu1  ;;  %1272 = sbr.rel (!%p2209_p12) target bundleno = 449 (0x1c1), region = 52 }
 0x19e   : > { %v1007_v34 = vadd.f32 %v2013_v6, %v685_v32  ;;  %v1039_v35 = vadd.f32 %v2013_v6, %v765_v33  ;;  %v687_v36 = vpop.f32.mrb[31].mxu0  ;;  %v767_v37 = vpop.f32.mrb[31].mxu1 }
 0x19f   : > { %v1497_v38 = vpack.c.bf16 %v1006_v30, %v1005_v26  ;;  %v1513_v39 = vpack.c.bf16 %v1038_v31, %v1037_v27  ;;  %v1008_v40 = vadd.f32 %v2015_v7, %v687_v36  ;;  %v1040_v41 = vadd.f32 %v2015_v7, %v767_v37 }
 0x1a1   : > { %1247 = vst [vmem:[%s2026_s6 + $0x70] sm:$0xff] %v1497_v38  ;;  %1263 = vst [vmem:[%s2026_s6 + $0xf0] sm:$0xff] %v1513_v39  ;;  %v1498_v42 = vpack.c.bf16 %v1008_v40, %v1007_v34  ;;  %v1514_v43 = vpack.c.bf16 %v1040_v41, %v1039_v35 }
 0x1a3   : > { %1248 = vst [vmem:[%s2026_s6 + $0x78] sm:$0xff] %v1498_v42  ;;  %1264 = vst [vmem:[%s2026_s6 + $0xf8] sm:$0xff] %v1514_v43 }
 0x1a4   : > { %s2221_s21 = smov (!%p1276_p13, %s1275_s21), 2 }
 0x1a5   : > { %s2123_s8 = sshll.u32 %s2221_s21, 11 }
 0x1a6   : > { %s1280_s9 = ssub.s32 4096, %s2123_s8 }
 0x1a7   : > { %1281 = vsyncadd %s1266_s18, %s1280_s9  ;;  %p1473_p1 = scmp.ne.s32.totalorder %s2123_s8, 0  ;;  %s1515_s26 = sshll.u32 %s1765_s15, 7 }
 0x1a8   : > { %s2133_s22 = scalar_lea.hbm %s2193_s3, %s1515_s26  ;;  %s1475_s10 = sshll.u32 %s2221_s21, 2 }
 0x1a9   : > { %s1289_s5 = sshll.u32 %s2026_s6, 4  ;;  %s1782_s25 = smov [#allocation8]   ;;  %s2137_s5 = int_to_ptr.vmem [resolvable:$true] %s1289_s5 }
 0x1aa   : > { %s1687_s23 = scalar_lea.vmem %s2137_s5, %s2123_s8  ;;  %s1691_s29 = sshll.u32 %s1782_s25, 4  ;;  %s1692_s29 = int_to_ptr.vmem [resolvable:$false] %s1691_s29 }
 0x1ab   : > { %p1688_p11 = scmp.ne.s32.totalorder %s2137_s5, %s1687_s23  ;;  %s1693_s15 = scalar_lea.vmem %s1692_s29, 8192 }
 0x1ac   : > { %p1694_p9 = scmp.lt.s32.totalorder %s2137_s5, %s1692_s29  ;;  %p1695_p2 = scmp.lt.s32.totalorder %s1693_s15, %s1687_s23 }
 0x1ad   : > { %p1689_p4 = pnand %p1688_p11, %p1473_p1 }
 0x1ae   : > { %p1696_p6 = por %p1695_p2, %p1694_p9 }
 0x1af   : > { %p1690_p8 = pneg %p1689_p4 }
 0x1b1   : > { %p1697_p0 = pnand %p1696_p6, %p1690_p8 }
 0x1b3   : > { %1700 = shalt.err (!%p1697_p0)
}
 0x1b4   : > { %s1701_s11 = scalar_lea.hbm %s2133_s22, %s2123_s8  ;;  %s1705_s6 = scalar_lea.hbm %s2193_s3, 6144 }
 0x1b5   : > { %p1702_p7 = scmp.ne.s32.totalorder %s2133_s22, %s1701_s11  ;;  %p1706_p12 = scmp.lt.u32.totalorder %s2133_s22, %s2193_s3 }
 0x1b6   : > { %p1707_p13 = scmp.lt.u32.totalorder %s1705_s6, %s1701_s11  ;;  %p1709_p4 = scmp.lt.u32.totalorder %s1701_s11, %s2133_s22 }
 0x1b7   : > { %p1703_p5 = pnand %p1702_p7, %p1473_p1 }
 0x1b8   : > { %p1708_p11 = por %p1707_p13, %p1706_p12 }
 0x1b9   : > { %p1704_p10 = pneg %p1703_p5 }
 0x1ba   : > { %p1710_p8 = por %p1709_p4, %p1708_p11 }
 0x1bc   : > { %p1711_p9 = pnand %p1710_p8, %p1704_p10 }
 0x1be   : > { %1714 = shalt.err (!%p1711_p9)
}
 0x1bf   : > { %s1783_s7 = smov 128   ;;  %s1784_s4 = smov 192  }
 0x1c0   : > { %1295 = dma.vmem_to_hbm [thread:$0]  (%p1473_p1), %s2137_s5, %s2123_s8, %s2133_s22, %s1266_s18, %s1783_s7, %s1784_s4, %s1475_s10  }
 0x1c1 PF: > { %s1304_s23 = sand.u32 1, %s1753_s12   ;;  %p2210_p2 = scmp.ne.s32.totalorder %s2202_s28, 0 }
 0x1c2   : > { %s1305_s25 = scalar_lea.sflag [#allocation5], %s1304_s23 }
 0x1c3   : > { %p1545_p6 = pnand %p1408_p3, %p2210_p2 }
 0x1c5   : > { %1748 = dma.done.wait (!%p1545_p6), %s1305_s25, 4096  }
 0x1c6   : > { %1750 = vsyncadd (!%p1545_p6), %s1305_s25, 4294963200  ;;  %s20_s17 = sadd.s32 1, %s1773_s17   ;;  %s2211_s12 = smov %s1757_s13 }
 0x1c7   : > { %p17_p0 = scmp.ge.s32.totalorder %s20_s17, 4   ;;  %s2212_s13 = smov %s1761_s14 }
 0x1c8   : > { %s2213_s14 = smov %s1867_s27  ;;  %s2214_s15 = smov %s1769_s16 }
 0x1c9   : > { %s2215_s16 = smov %s2217_s20  ;;  %19 = sbr.rel (!%p17_p0) target bundleno = 7 (0x7), region = 94 }
 0x1d0   :  { %1310 = vsyncpa [#allocation4], 1 }
 0x1d1   :  { %1312 = vsyncpa [#allocation4 + $0x1], 1 }
 0x1d2   :  { %1313 = vsyncpa [#allocation7], 1 }
 0x1d3   :  { %1315 = vsyncpa [#allocation7 + $0x1], 1 }
 0x1d4   :  { %1316 = vsyncpa [#allocation5], 1 }
 0x1d5   :  { %1318 = vsyncpa [#allocation5 + $0x1], 1 }

</bundles_post_ra>
